<compile_context>
chip_gen: v7x
topology: tpu7x:2x2x1
jax: 0.10.0
libtpu: 0.0.40
codegen_flags: <defaults>
</compile_context>

<pallas_src>
import jax
import jax.numpy as jnp
from jax.experimental import pallas as pl
from jax.experimental.pallas import tpu as pltpu


IN_FEATURES = 5
OUT_FEATURES = 32


def _model_kernel(wb_ref, x1_ref, x2_ref, x3_ref, x4_ref, x5_ref, o_ref):
    # wb_ref: VMEM (8,32) f32 -> rows 0..4 = W (in,out), row 5 = b, rows 6..7 pad
    # x1_ref: SMEM (1,5)  f32
    # x2_ref: VMEM (1,32) f32
    # x3_ref: VMEM (1,32) f32
    # x4_ref: SMEM (1,1)  f32
    # x5_ref: VMEM (1,32) f32
    # o_ref : VMEM (1,32) f32

    # Hoist scalar reads to locals.
    s0 = x1_ref[0, 0]
    s1 = x1_ref[0, 1]
    s2 = x1_ref[0, 2]
    s3 = x1_ref[0, 3]
    s4 = x1_ref[0, 4]
    s_x4 = x4_ref[0, 0]

    # (1,5) @ (5,32) as 5 VPU scalar*vector FMAs, tree-reduced.
    # Direct per-row VMEM loads (no whole-tile load + sublane slicing).
    acc01 = s0 * wb_ref[0:1, :] + s1 * wb_ref[1:2, :]
    acc23 = s2 * wb_ref[2:3, :] + s3 * wb_ref[3:4, :]
    acc = (acc01 + acc23) + s4 * wb_ref[4:5, :]

    # Bias fold in-kernel, then the subtract+relu chain.
    v = acc + wb_ref[5:6, :]                       # x1 @ W + b
    v = jnp.maximum(v - x2_ref[...], 0.0)          # relu(. - x2)
    v = jnp.maximum(v - x3_ref[...], 0.0)          # relu(. - x3)
    v = jnp.maximum(v - s_x4, 0.0)                 # relu(. - x4) (scalar bcast)
    v = jnp.maximum(v - x5_ref[...], 0.0)          # relu(. - x5)
    o_ref[...] = v.astype(o_ref.dtype)


def model_forward(wb_packed, x1, x2, x3, x4, x5):
    """wb_packed is the STATIC (8,32) block built once by pack_params()."""
    return pl.pallas_call(
        _model_kernel,
        out_shape=jax.ShapeDtypeStruct((1, OUT_FEATURES), jnp.float32),
        in_specs=[
            pl.BlockSpec(memory_space=pltpu.MemorySpace.VMEM),  # wb_packed (8,32)
            pl.BlockSpec(memory_space=pltpu.MemorySpace.SMEM),  # x1 (1,5)
            pl.BlockSpec(memory_space=pltpu.MemorySpace.VMEM),  # x2 (1,32)
            pl.BlockSpec(memory_space=pltpu.MemorySpace.VMEM),  # x3 (1,32)
            pl.BlockSpec(memory_space=pltpu.MemorySpace.SMEM),  # x4 (1,1)
            pl.BlockSpec(memory_space=pltpu.MemorySpace.VMEM),  # x5 (1,32)
        ],
        out_specs=pl.BlockSpec(memory_space=pltpu.MemorySpace.VMEM),
    )(wb_packed, x1, x2, x3, x4, x5)


def init_params(key):
    # Mimic PyTorch nn.Linear default init: U(-1/sqrt(in), 1/sqrt(in))
    kw, kb = jax.random.split(key)
    bound = 1.0 / (IN_FEATURES ** 0.5)
    # stored as (in, out) == transpose of PyTorch's (out, in)
    w = jax.random.uniform(kw, (IN_FEATURES, OUT_FEATURES),
                           minval=-bound, maxval=bound, dtype=jnp.float32)
    b = jax.random.uniform(kb, (1, OUT_FEATURES),
                           minval=-bound, maxval=bound, dtype=jnp.float32)
    return w, b


def pack_params(w, b):
    """One-time static packing: W rows 0..4, b row 5, zero pad rows 6..7."""
    pad = jnp.zeros((2, OUT_FEATURES), dtype=jnp.float32)
    return jnp.concatenate(
        [w.astype(jnp.float32), b.astype(jnp.float32), pad], axis=0)  # (8,32)


if __name__ == "__main__":
    key = jax.random.PRNGKey(0)
    k_params, k1, k2, k3, k4, k5 = jax.random.split(key, 6)

    w, b = init_params(k_params)
    wb_packed = jax.block_until_ready(pack_params(w, b))  # init-time, not per call

    x1 = jax.random.normal(k1, (1, IN_FEATURES), dtype=jnp.float32)
    x2 = jax.random.normal(k2, (1, OUT_FEATURES), dtype=jnp.float32)
    x3 = jax.random.normal(k3, (1, OUT_FEATURES), dtype=jnp.float32)
    x4 = jax.random.normal(k4, (1, 1), dtype=jnp.float32)
    x5 = jax.random.normal(k5, (1, OUT_FEATURES), dtype=jnp.float32)

    out = model_forward(wb_packed, x1, x2, x3, x4, x5)
    out = jax.block_until_ready(out)

    # Pure-JAX reference check
    ref = x1 @ w + b
    ref = jnp.maximum(ref - x2, 0.0)
    ref = jnp.maximum(ref - x3, 0.0)
    ref = jnp.maximum(ref - x4, 0.0)
    ref = jnp.maximum(ref - x5, 0.0)
    assert out.shape == (1, OUT_FEATURES)
    assert jnp.allclose(out, ref, atol=1e-5), "mismatch vs reference"

    print("KERNEL_OK")
</pallas_src>

<mosaic_0001>
module attributes {stable_mosaic.version = 11 : i64} {
  func.func @_model_kernel(%arg0: memref<8x32xf32, #tpu.memory_space<vmem>>, %arg1: memref<1x5xf32, #tpu.memory_space<smem>>, %arg2: memref<1x32xf32, #tpu.memory_space<vmem>>, %arg3: memref<1x32xf32, #tpu.memory_space<vmem>>, %arg4: memref<1x1xf32, #tpu.memory_space<smem>>, %arg5: memref<1x32xf32, #tpu.memory_space<vmem>>, %arg6: memref<1x32xf32, #tpu.memory_space<vmem>>) attributes {dimension_semantics = [], scalar_prefetch = 0 : i64, scratch_operands = 0 : i64, tpu.core_type = #tpu.core_type<tc>} {
    %c0 = arith.constant 0 : index
    %c0_0 = arith.constant 0 : index
    %0 = memref.load %arg1[%c0, %c0_0] : memref<1x5xf32, #tpu.memory_space<smem>>
    %c0_1 = arith.constant 0 : index
    %c1 = arith.constant 1 : index
    %1 = memref.load %arg1[%c0_1, %c1] : memref<1x5xf32, #tpu.memory_space<smem>>
    %c0_2 = arith.constant 0 : index
    %c2 = arith.constant 2 : index
    %2 = memref.load %arg1[%c0_2, %c2] : memref<1x5xf32, #tpu.memory_space<smem>>
    %c0_3 = arith.constant 0 : index
    %c3 = arith.constant 3 : index
    %3 = memref.load %arg1[%c0_3, %c3] : memref<1x5xf32, #tpu.memory_space<smem>>
    %c0_4 = arith.constant 0 : index
    %c4 = arith.constant 4 : index
    %4 = memref.load %arg1[%c0_4, %c4] : memref<1x5xf32, #tpu.memory_space<smem>>
    %c0_5 = arith.constant 0 : index
    %c0_6 = arith.constant 0 : index
    %5 = memref.load %arg4[%c0_5, %c0_6] : memref<1x1xf32, #tpu.memory_space<smem>>
    %c0_7 = arith.constant 0 : index
    %c0_8 = arith.constant 0 : index
    %6 = vector.load %arg0[%c0_7, %c0_8] : memref<8x32xf32, #tpu.memory_space<vmem>>, vector<1x32xf32>
    %7 = vector.broadcast %0 : f32 to vector<1x32xf32>
    %8 = arith.mulf %7, %6 : vector<1x32xf32>
    %c1_9 = arith.constant 1 : index
    %c0_10 = arith.constant 0 : index
    %9 = vector.load %arg0[%c1_9, %c0_10] : memref<8x32xf32, #tpu.memory_space<vmem>>, vector<1x32xf32>
    %10 = vector.broadcast %1 : f32 to vector<1x32xf32>
    %11 = arith.mulf %10, %9 : vector<1x32xf32>
    %12 = arith.addf %8, %11 : vector<1x32xf32>
    %c2_11 = arith.constant 2 : index
    %c0_12 = arith.constant 0 : index
    %13 = vector.load %arg0[%c2_11, %c0_12] : memref<8x32xf32, #tpu.memory_space<vmem>>, vector<1x32xf32>
    %14 = vector.broadcast %2 : f32 to vector<1x32xf32>
    %15 = arith.mulf %14, %13 : vector<1x32xf32>
    %c3_13 = arith.constant 3 : index
    %c0_14 = arith.constant 0 : index
    %16 = vector.load %arg0[%c3_13, %c0_14] : memref<8x32xf32, #tpu.memory_space<vmem>>, vector<1x32xf32>
    %17 = vector.broadcast %3 : f32 to vector<1x32xf32>
    %18 = arith.mulf %17, %16 : vector<1x32xf32>
    %19 = arith.addf %15, %18 : vector<1x32xf32>
    %20 = arith.addf %12, %19 : vector<1x32xf32>
    %c4_15 = arith.constant 4 : index
    %c0_16 = arith.constant 0 : index
    %21 = vector.load %arg0[%c4_15, %c0_16] : memref<8x32xf32, #tpu.memory_space<vmem>>, vector<1x32xf32>
    %22 = vector.broadcast %4 : f32 to vector<1x32xf32>
    %23 = arith.mulf %22, %21 : vector<1x32xf32>
    %24 = arith.addf %20, %23 : vector<1x32xf32>
    %c5 = arith.constant 5 : index
    %c0_17 = arith.constant 0 : index
    %25 = vector.load %arg0[%c5, %c0_17] : memref<8x32xf32, #tpu.memory_space<vmem>>, vector<1x32xf32>
    %26 = arith.addf %24, %25 : vector<1x32xf32>
    %c0_18 = arith.constant 0 : index
    %c0_19 = arith.constant 0 : index
    %27 = vector.load %arg2[%c0_18, %c0_19] : memref<1x32xf32, #tpu.memory_space<vmem>>, vector<1x32xf32>
    %28 = arith.subf %26, %27 : vector<1x32xf32>
    %cst = arith.constant 0.000000e+00 : f32
    %29 = vector.broadcast %cst : f32 to vector<1x32xf32>
    %30 = arith.maximumf %28, %29 : vector<1x32xf32>
    %c0_20 = arith.constant 0 : index
    %c0_21 = arith.constant 0 : index
    %31 = vector.load %arg3[%c0_20, %c0_21] : memref<1x32xf32, #tpu.memory_space<vmem>>, vector<1x32xf32>
    %32 = arith.subf %30, %31 : vector<1x32xf32>
    %cst_22 = arith.constant 0.000000e+00 : f32
    %33 = vector.broadcast %cst_22 : f32 to vector<1x32xf32>
    %34 = arith.maximumf %32, %33 : vector<1x32xf32>
    %35 = vector.broadcast %5 : f32 to vector<1x32xf32>
    %36 = arith.subf %34, %35 : vector<1x32xf32>
    %cst_23 = arith.constant 0.000000e+00 : f32
    %37 = vector.broadcast %cst_23 : f32 to vector<1x32xf32>
    %38 = arith.maximumf %36, %37 : vector<1x32xf32>
    %c0_24 = arith.constant 0 : index
    %c0_25 = arith.constant 0 : index
    %39 = vector.load %arg5[%c0_24, %c0_25] : memref<1x32xf32, #tpu.memory_space<vmem>>, vector<1x32xf32>
    %40 = arith.subf %38, %39 : vector<1x32xf32>
    %cst_26 = arith.constant 0.000000e+00 : f32
    %41 = vector.broadcast %cst_26 : f32 to vector<1x32xf32>
    %42 = arith.maximumf %40, %41 : vector<1x32xf32>
    %c0_27 = arith.constant 0 : index
    %c0_28 = arith.constant 0 : index
    %43 = vector.load %arg6[%c0_27, %c0_28] : memref<1x32xf32, #tpu.memory_space<vmem>>, vector<1x32xf32>
    tpu.vector_store %arg6[%c0_27, %c0_28], %42 {strides = array<i32>} : memref<1x32xf32, #tpu.memory_space<vmem>>, vector<1x32xf32>,
    return
  }
}

</mosaic_0001>

<bundles_post_ra>
// kernel: tpu_custom_call.1
= control target key start
LH: loop header
LB: loop body
LE: loop exit
PB: predicated region body
PF: predicated region fallthrough
CT: control target
= control target key end

     0   :  { %12 = vsyncpa [#allocation4], 0  ;;  %s253_s0 = inlined_call_operand.hbm [shape: f32[8,32], index: 0, kind: input, shape index: {}]   ;;  %s254_s1 = inlined_call_operand.vmem [shape: f32[1,5], index: 1, kind: input, shape index: {}]   ;;  %s255_s2 = inlined_call_operand.vmem [shape: f32[1,32], index: 2, kind: input, shape index: {}]   ;;  %s256_s3 = inlined_call_operand.vmem [shape: f32[1,32], index: 3, kind: input, shape index: {}]   ;;  %s257_s4 = inlined_call_operand.<no memory space> [shape: f32[1,1], index: 4, kind: input, shape index: {}]   ;;  %s258_s5 = inlined_call_operand.vmem [shape: f32[1,32], index: 5, kind: input, shape index: {}]   ;;  %s259_s6 = inlined_call_operand.hbm [shape: f32[1,32], index: 6, kind: output, shape index: {}]  }
   0x1   :  { %13 = vsyncpa [#allocation6], 0 }
   0x2   :  { %14 = vsyncpa [#allocation5], 0  ;;  %s31_s23 = sshll.u32 %s254_s1, 4  ;;  %s176_s24 = smov [#allocation3]   ;;  %s32_s23 = int_to_ptr.vmem [resolvable:$true] %s31_s23 }
   0x3   :  { %s21_s25 = sshll.u32 %s176_s24, 4  ;;  %s114_s28 = scalar_lea.hbm %s253_s0, 128  ;;  %s22_s25 = int_to_ptr.vmem [resolvable:$true] %s21_s25 }
   0x4   :  { %p115_p0 = scmp.ne.s32.totalorder %s253_s0, %s114_s28  ;;  %p118_p1 = scmp.lt.u32.totalorder %s114_s28, %s253_s0 }
   0x6   :  { %p120_p2 = pnand %p118_p1, %p115_p0 }
   0x8   :  { %123 = shalt.err (!%p120_p2)
}
   0x9   :  { %s124_s9 = scalar_lea.vmem %s22_s25, 128  ;;  %p129_p4 = scmp.lt.s32.totalorder %s22_s25, %s22_s25 }
   0xa   :  { %p125_p3 = scmp.ne.s32.totalorder %s22_s25, %s124_s9  ;;  %p130_p5 = scmp.lt.s32.totalorder %s124_s9, %s124_s9 }
   0xc   :  { %p131_p6 = por %p130_p5, %p129_p4 }
   0xe   :  { %p132_p7 = pnand %p131_p6, %p125_p3 }
  0x10   :  { %135 = shalt.err (!%p132_p7)
}
  0x11   :  { %24 = dma.hbm_to_vmem [thread:$0]  %s253_s0, 128, %s22_s25, [#allocation4]  }
  0x12   :  { %s136_s11 = scalar_lea.vmem %s32_s23, 16  ;;  %p141_p9 = scmp.lt.s32.totalorder %s32_s23, %s32_s23 }
  0x13   :  { %p137_p8 = scmp.ne.s32.totalorder %s32_s23, %s136_s11  ;;  %p142_p10 = scmp.lt.s32.totalorder %s136_s11, %s136_s11 }
  0x15   :  { %p143_p11 = por %p142_p10, %p141_p9 }
  0x17   :  { %p144_p12 = pnand %p143_p11, %p137_p8 }
  0x19   :  { %147 = shalt.err (!%p144_p12)
}
  0x1a   :  { %s177_s12 = smov [#allocation7]  }
  0x1b   :  { %34 = dma.vmem_to_smem %s32_s23, 16, %s177_s12, [#allocation6]  }
  0x1c   :  { %170 = dma.done.wait [#allocation4], 128  }
  0x1d   :  { %171 = vsyncadd [#allocation4], 4294967168 }
  0x1e   :  { %172 = dma.done.wait [#allocation6], 16  }
  0x1f   :  { %173 = vsyncadd [#allocation6], 4294967280 }
  0x20   :  { %49 = sfence }
  0x21   :  { %s50_s13 = sld [smem:[#allocation7]]  ;;  %s107_s14 = sld [smem:[#allocation7 + $0x1]]  ;;  %v56_v0 = vld [vmem:[#allocation3] sm:$0x1]  ;;  %v59_v1 = vld [vmem:[#allocation3 + $0x1] sm:$0x1]  ;;  %v83_v26 = vstv %s257_s4 }
  0x22   :  { %s108_s15 = sld [smem:[#allocation7 + $0x2]]  ;;  %s109_s16 = sld [smem:[#allocation7 + $0x3]]  ;;  %v63_v2 = vld [vmem:[#allocation3 + $0x2] sm:$0x1]  ;;  %v66_v3 = vld [vmem:[#allocation3 + $0x3] sm:$0x1] }
  0x23   :  { %s110_s17 = sld [smem:[#allocation7 + $0x4]]  ;;  %v71_v10 = vld [vmem:[#allocation3 + $0x4] sm:$0x1]  ;;  %v75_v18 = vld [vmem:[#allocation3 + $0x5] sm:$0x1]  ;;  %vm89_vm0 = vcmask 253952  }
  0x24   :  { %v77_v20 = vld [vmem:[%s255_s2] sm:$0x1]  ;;  %s178_s2 = smov [#allocation8]  }
  0x25   :  { %v80_v23 = vld [vmem:[%s256_s3] sm:$0x1]  ;;  %s97_s25 = sshll.u32 %s178_s2, 4  ;;  %s98_s25 = int_to_ptr.vmem [resolvable:$true] %s97_s25 }
  0x26   :  { %v86_v29 = vld [vmem:[%s258_s5] sm:$0x1]  ;;  %s148_s3 = scalar_lea.vmem %s98_s25, 16  ;;  %s152_s26 = scalar_lea.vmem %s98_s25, 32 }
  0x27   :  { %v57_v4 = vstv %s50_s13  ;;  %v60_v5 = vstv %s107_s14  ;;  %p149_p13 = scmp.ne.s32.totalorder %s98_s25, %s148_s3  ;;  %p153_p0 = scmp.lt.s32.totalorder %s98_s25, %s98_s25 }
  0x28   :  { %v58_v6 = vmul.f32 %v57_v4, %v56_v0  ;;  %v61_v7 = vmul.f32 %v60_v5, %v59_v1  ;;  %v64_v8 = vstv %s108_s15  ;;  %v67_v9 = vstv %s109_s16  ;;  %p154_p1 = scmp.lt.s32.totalorder %s152_s26, %s148_s3 }
  0x29   :  { %v65_v11 = vmul.f32 %v64_v8, %v63_v2  ;;  %v68_v12 = vmul.f32 %v67_v9, %v66_v3  ;;  %v72_v13 = vstv %s110_s17 }
  0x2a   :  { %v62_v14 = vadd.f32 %v61_v7, %v58_v6  ;;  %v73_v16 = vmul.f32 %v72_v13, %v71_v10  ;;  %p155_p2 = por %p154_p1, %p153_p0 }
  0x2b   :  { %v69_v15 = vadd.f32 %v68_v12, %v65_v11 }
  0x2c   :  { %p156_p3 = pnand %p155_p2, %p149_p13 }
  0x2d   :  { %v70_v17 = vadd.f32 %v69_v15, %v62_v14 }
  0x2f   :  { %v74_v19 = vadd.f32 %v73_v16, %v70_v17 }
  0x31   :  { %v76_v21 = vadd.f32 %v75_v18, %v74_v19 }
  0x33   :  { %v78_v22 = vsub.f32 %v76_v21, %v77_v20 }
  0x35   :  { %v79_v24 = vmax.f32 %v78_v22, 0.0 }
  0x37   :  { %v81_v25 = vsub.f32 %v79_v24, %v80_v23 }
  0x39   :  { %v82_v27 = vmax.f32 %v81_v25, 0.0 }
  0x3b   :  { %v84_v28 = vsub.f32 %v82_v27, %v83_v26 }
  0x3d   :  { %v85_v30 = vmax.f32 %v84_v28, 0.0 }
  0x3f   :  { %v87_v31 = vsub.f32 %v85_v30, %v86_v29 }
  0x41   :  { %v88_v32 = vmax.f32 %v87_v31, 0.0 }
  0x43   :  { %90 = vst.msk [vmem:[#allocation8] sm:$0x1] %vm89_vm0, %v88_v32 }
  0x44   :  { %159 = shalt.err (!%p156_p3)
}
  0x45   :  { %s160_s5 = scalar_lea.hbm %s259_s6, 16 }
  0x46   :  { %p161_p4 = scmp.ne.s32.totalorder %s259_s6, %s160_s5  ;;  %p164_p5 = scmp.lt.u32.totalorder %s160_s5, %s259_s6 }
  0x48   :  { %p166_p6 = pnand %p164_p5, %p161_p4 }
  0x4a   :  { %169 = shalt.err (!%p166_p6)
}
  0x4b   :  { %100 = dma.vmem_to_hbm [thread:$0]  %s98_s25, 16, %s259_s6, [#allocation5]  }
  0x4c   :  { %174 = dma.done.wait [#allocation5], 16  }
  0x4d   :  { %175 = vsyncadd [#allocation5], 4294967280 }
  0x4e   :  { %104 = vsyncpa [#allocation4], 1 }
  0x4f   :  { %105 = vsyncpa [#allocation5], 1 }
  0x50   :  { %106 = vsyncpa [#allocation6], 1 }

</bundles_post_ra>
